<compile_context>
chip_gen: v6e
topology: v6e:2x2x1
jax: 0.10.0
libtpu: 0.0.40
codegen_flags: <defaults>
</compile_context>

<pallas_src>
import functools

import jax
import jax.numpy as jnp
from jax.experimental import pallas as pl
from jax.experimental.pallas import tpu as pltpu


def _cdiv(a, b):
    return (a + b - 1) // b


def _round_up(a, b):
    return _cdiv(a, b) * b


def _amm_sum_kernel(x_ref, c_col_ref, c_row_ref, acc_ref, *, tm, cols):
    """Accumulate sum over this row tile of relu(c_col + x) + relu(c_row + x).

    acc_ref is a per-split (8, 128) f32 accumulator (output block, resident
    across the inner 'arbitrary' grid axis). All per-tile reduction is plain
    VPU adds on (8, cols) chunks; the cross-lane reduce happens in the wrapper.
    """
    i = pl.program_id(1)

    @pl.when(i == 0)
    def _init():
        acc_ref[...] = jnp.zeros_like(acc_ref)

    # Loop-invariant row of constants: broadcast once per tile, not per chunk.
    c_row8 = jnp.broadcast_to(c_row_ref[...], (8, cols))

    def chunk(r):
        xg = x_ref[8 * r:8 * (r + 1), :].astype(jnp.float32)   # (8, cols)
        cg = c_col_ref[8 * r:8 * (r + 1), :]                   # (8, 1) f32
        return jnp.maximum(cg + xg, 0.0) + jnp.maximum(c_row8 + xg, 0.0)

    # Serial accumulation keeps only one (8, cols) partial live (no vreg spills);
    # the kernel is HBM-bound so VPU dependency depth is not on the critical path.
    partial = chunk(0)
    for r in range(1, tm // 8):            # unrolled; sublane-tile aligned slices, VPU only
        partial = partial + chunk(r)

    folded = partial[:, 0:128]             # lane-tile aligned static slices, VPU only
    for q in range(1, cols // 128):
        folded = folded + partial[:, 128 * q:128 * (q + 1)]

    acc_ref[...] += folded


def adaptive_max_margin_ranking_loss(x, weight, margin=0.4, fix_norm=True,
                                     block_rows=None):
    """Pallas TPU forward of AdaptiveMaxMarginRankingLoss (EgoVLPv2)."""
    n = x.shape[0]
    assert x.shape == (n, n), x.shape
    assert weight.shape == (n,), weight.shape
    # Note: for tiny n (say < 64) a plain-JAX path would avoid the ~0.35us/step
    # grid overhead + custom-call launch; we keep the Pallas path so the kernel
    # is always exercised here.

    w32 = weight.astype(jnp.float32)
    c = margin * w32 - jnp.diagonal(x).astype(jnp.float32)      # (n,) = m*w[i] - x[i,i]

    cols = _round_up(n, 128)
    rows8 = _round_up(n, 8)
    itemsize = jnp.dtype(x.dtype).itemsize

    # Row tile sized so one x tile is <= ~4 MiB in the input dtype
    # (double-buffered <= ~8 MiB: fits v7x's 64 MiB VMEM and default scoped limits).
    if block_rows is None:
        tm_cap = (4 * 1024 * 1024) // (itemsize * cols)
    else:
        tm_cap = block_rows
    tm_cap = max(8, min(512, tm_cap)) // 8 * 8

    tiles_total = _cdiv(rows8, tm_cap)
    # Leading 'parallel' axis of size 2 -> v7x's two TensorCores each reduce half
    # of the rows into their own (8,128) slab. Sequential (harmless) on v5e/v6e.
    splits = 2 if tiles_total >= 2 else 1
    tps = _cdiv(tiles_total, splits)
    tm = _round_up(_cdiv(rows8, splits * tps), 8)
    rows_pad = splits * tps * tm

    # Pad with -1e9 so padded rows/cols contribute exactly 0 through the relu.
    # x stays in its native dtype (bf16 halves HBM bytes); cast happens in-kernel.
    if rows_pad != n or cols != n:
        x_p = jnp.pad(x, ((0, rows_pad - n), (0, cols - n)),
                      constant_values=jnp.asarray(-1e9, x.dtype))
    else:
        x_p = x
    c_col = jnp.pad(c, (0, rows_pad - n)).reshape(rows_pad, 1)
    c_row = jnp.pad(c, (0, cols - n)).reshape(1, cols)

    kernel = functools.partial(_amm_sum_kernel, tm=tm, cols=cols)
    acc = pl.pallas_call(
        kernel,
        out_shape=jax.ShapeDtypeStruct((splits * 8, 128), jnp.float32),
        grid_spec=pltpu.PrefetchScalarGridSpec(
            num_scalar_prefetch=0,
            grid=(splits, tps),
            in_specs=[
                pl.BlockSpec((tm, cols), lambda s, i: (s * tps + i, 0)),
                pl.BlockSpec((tm, 1), lambda s, i: (s * tps + i, 0)),
                pl.BlockSpec((1, cols), lambda s, i: (0, 0)),
            ],
            out_specs=pl.BlockSpec((8, 128), lambda s, i: (s, 0)),
        ),
        compiler_params=pltpu.CompilerParams(
            dimension_semantics=("parallel", "arbitrary"),
            vmem_limit_bytes=32 * 1024 * 1024,
        ),
    )(x_p, c_col, c_row)

    total = jnp.sum(acc)                     # splits*8*128 floats: trivial XLA reduce
    if fix_norm:
        # Diagonal appears once in each half: 2 * sum_i relu(margin * w[i]).
        diag_contrib = 2.0 * jnp.sum(jnp.maximum(margin * w32, 0.0))
        return (total - diag_contrib) / (2.0 * n * (n - 1))
    return total / (2.0 * n * n)


def _reference_loss(x, weight, margin=0.4, fix_norm=True):
    # Straight JAX transcription of the PyTorch forward (verification only).
    n = x.shape[0]
    x1 = jnp.diag(x)[:, None] * jnp.ones((n, n), x.dtype)
    x1 = x1.reshape(-1, 1)
    x1 = jnp.concatenate([x1, x1], 0)
    w1 = weight[:, None] * jnp.ones((n, n), x.dtype)
    w1 = w1.reshape(-1, 1)
    w1 = jnp.concatenate([w1, w1], 0)
    x2 = x.reshape(-1, 1)
    x3 = x.T.reshape(-1, 1)
    x2 = jnp.concatenate([x2, x3], 0)
    max_margin = jnp.maximum(w1 * margin - (x1 - x2), 0.0)
    if fix_norm:
        keep = jnp.ones((n, n)) - jnp.eye(n)
        keep_cat = jnp.concatenate([keep.reshape(-1, 1), keep.T.reshape(-1, 1)], 0).flatten()
        mask = keep_cat > 0
        vals = max_margin.flatten()
        return jnp.sum(jnp.where(mask, vals, 0.0)) / jnp.sum(mask)
    return jnp.mean(max_margin)


if __name__ == "__main__":
    key = jax.random.PRNGKey(0)
    kx, kw = jax.random.split(key)

    checks = []

    # aligned n, multi-tile, 2-way split path
    n = 256
    x = jax.random.normal(kx, (n, n), dtype=jnp.float32)
    w = jax.random.uniform(kw, (n,), dtype=jnp.float32, minval=0.5, maxval=1.5)
    got = jax.block_until_ready(
        adaptive_max_margin_ranking_loss(x, w, margin=0.4, fix_norm=True, block_rows=64))
    checks.append(("n256_f32", got, _reference_loss(x, w, 0.4, True), 1e-4))

    # native bf16 streaming (cast to f32 inside the kernel)
    xb = x.astype(jnp.bfloat16)
    got_b = jax.block_until_ready(
        adaptive_max_margin_ranking_loss(xb, w, margin=0.4, fix_norm=True, block_rows=64))
    checks.append(("n256_bf16", got_b,
                   _reference_loss(xb.astype(jnp.float32), w, 0.4, True), 1e-3))

    # unaligned n (padding path), single tile
    m = 100
    x2 = jax.random.normal(jax.random.PRNGKey(1), (m, m), dtype=jnp.float32)
    w2 = jax.random.uniform(jax.random.PRNGKey(2), (m,), dtype=jnp.float32,
                            minval=0.5, maxval=1.5)
    got2 = jax.block_until_ready(
        adaptive_max_margin_ranking_loss(x2, w2, margin=0.4, fix_norm=True))
    checks.append(("n100_pad", got2, _reference_loss(x2, w2, 0.4, True), 1e-4))

    # unaligned + multi-tile + fix_norm=False branch
    got3 = jax.block_until_ready(
        adaptive_max_margin_ranking_loss(x2, w2, margin=0.4, fix_norm=False, block_rows=32))
    checks.append(("n100_nofix", got3, _reference_loss(x2, w2, 0.4, False), 1e-4))

    for name, out, ref, tol in checks:
        assert jnp.allclose(out, ref, atol=tol, rtol=tol), (name, out, ref)

    print("KERNEL_OK")
</pallas_src>

<mosaic_0001>
module attributes {stable_mosaic.version = 11 : i64} {
  func.func @_amm_sum_kernel(%arg0: i32, %arg1: i32, %arg2: memref<64x256xf32, #tpu.memory_space<vmem>>, %arg3: memref<64x1xf32, #tpu.memory_space<vmem>>, %arg4: memref<1x256xf32, #tpu.memory_space<vmem>>, %arg5: memref<8x128xf32, #tpu.memory_space<vmem>>) attributes {dimension_semantics = [#tpu.dimension_semantics<parallel>, #tpu.dimension_semantics<arbitrary>], iteration_bounds = array<i64: 2, 2>, scalar_prefetch = 0 : i64, scratch_operands = 0 : i64, tpu.core_type = #tpu.core_type<tc>, window_params = [{transform_indices = @transform_0, window_bounds = array<i64: 64, 256>}, {transform_indices = @transform_1, window_bounds = array<i64: 64, 1>}, {pipeline_mode = #tpu.pipeline_mode<synchronous>, transform_indices = @transform_2, window_bounds = array<i64: 1, 256>}, {transform_indices = @transform_3, window_bounds = array<i64: 8, 128>}]} {
    %c0_i32 = arith.constant 0 : i32
    %0 = arith.cmpi eq, %arg1, %c0_i32 : i32
    %1 = arith.extui %0 : i1 to i32
    %c0_i32_0 = arith.constant 0 : i32
    %2 = arith.cmpi ne, %1, %c0_i32_0 : i32
    scf.if %2 {
      %cst_46 = arith.constant 0.000000e+00 : f32
      %99 = vector.broadcast %cst_46 : f32 to vector<8x128xf32>
      %c0_47 = arith.constant 0 : index
      %c0_48 = arith.constant 0 : index
      %100 = vector.load %arg5[%c0_47, %c0_48] : memref<8x128xf32, #tpu.memory_space<vmem>>, vector<8x128xf32>
      tpu.vector_store %arg5[%c0_47, %c0_48], %99 {strides = array<i32>} : memref<8x128xf32, #tpu.memory_space<vmem>>, vector<8x128xf32>,
    } else {
    }
    %c0 = arith.constant 0 : index
    %c0_1 = arith.constant 0 : index
    %3 = vector.load %arg4[%c0, %c0_1] : memref<1x256xf32, #tpu.memory_space<vmem>>, vector<1x256xf32>
    %4 = vector.shape_cast %3 : vector<1x256xf32> to vector<1x256xf32>
    %5 = vector.broadcast %4 : vector<1x256xf32> to vector<8x256xf32>
    %c0_2 = arith.constant 0 : index
    %c0_3 = arith.constant 0 : index
    %6 = vector.load %arg2[%c0_2, %c0_3] : memref<64x256xf32, #tpu.memory_space<vmem>>, vector<8x256xf32>
    %c0_4 = arith.constant 0 : index
    %c0_5 = arith.constant 0 : index
    %7 = vector.load %arg3[%c0_4, %c0_5] : memref<64x1xf32, #tpu.memory_space<vmem>>, vector<8x1xf32>
    %8 = vector.broadcast %7 : vector<8x1xf32> to vector<8x256xf32>
    %9 = arith.addf %8, %6 : vector<8x256xf32>
    %cst = arith.constant 0.000000e+00 : f32
    %10 = vector.broadcast %cst : f32 to vector<8x256xf32>
    %11 = arith.maximumf %9, %10 : vector<8x256xf32>
    %12 = arith.addf %5, %6 : vector<8x256xf32>
    %cst_6 = arith.constant 0.000000e+00 : f32
    %13 = vector.broadcast %cst_6 : f32 to vector<8x256xf32>
    %14 = arith.maximumf %12, %13 : vector<8x256xf32>
    %15 = arith.addf %11, %14 : vector<8x256xf32>
    %c8 = arith.constant 8 : index
    %c0_7 = arith.constant 0 : index
    %16 = vector.load %arg2[%c8, %c0_7] : memref<64x256xf32, #tpu.memory_space<vmem>>, vector<8x256xf32>
    %c8_8 = arith.constant 8 : index
    %c0_9 = arith.constant 0 : index
    %17 = vector.load %arg3[%c8_8, %c0_9] : memref<64x1xf32, #tpu.memory_space<vmem>>, vector<8x1xf32>
    %18 = vector.broadcast %17 : vector<8x1xf32> to vector<8x256xf32>
    %19 = arith.addf %18, %16 : vector<8x256xf32>
    %cst_10 = arith.constant 0.000000e+00 : f32
    %20 = vector.broadcast %cst_10 : f32 to vector<8x256xf32>
    %21 = arith.maximumf %19, %20 : vector<8x256xf32>
    %22 = arith.addf %5, %16 : vector<8x256xf32>
    %cst_11 = arith.constant 0.000000e+00 : f32
    %23 = vector.broadcast %cst_11 : f32 to vector<8x256xf32>
    %24 = arith.maximumf %22, %23 : vector<8x256xf32>
    %25 = arith.addf %21, %24 : vector<8x256xf32>
    %26 = arith.addf %15, %25 : vector<8x256xf32>
    %c16 = arith.constant 16 : index
    %c0_12 = arith.constant 0 : index
    %27 = vector.load %arg2[%c16, %c0_12] : memref<64x256xf32, #tpu.memory_space<vmem>>, vector<8x256xf32>
    %c16_13 = arith.constant 16 : index
    %c0_14 = arith.constant 0 : index
    %28 = vector.load %arg3[%c16_13, %c0_14] : memref<64x1xf32, #tpu.memory_space<vmem>>, vector<8x1xf32>
    %29 = vector.broadcast %28 : vector<8x1xf32> to vector<8x256xf32>
    %30 = arith.addf %29, %27 : vector<8x256xf32>
    %cst_15 = arith.constant 0.000000e+00 : f32
    %31 = vector.broadcast %cst_15 : f32 to vector<8x256xf32>
    %32 = arith.maximumf %30, %31 : vector<8x256xf32>
    %33 = arith.addf %5, %27 : vector<8x256xf32>
    %cst_16 = arith.constant 0.000000e+00 : f32
    %34 = vector.broadcast %cst_16 : f32 to vector<8x256xf32>
    %35 = arith.maximumf %33, %34 : vector<8x256xf32>
    %36 = arith.addf %32, %35 : vector<8x256xf32>
    %37 = arith.addf %26, %36 : vector<8x256xf32>
    %c24 = arith.constant 24 : index
    %c0_17 = arith.constant 0 : index
    %38 = vector.load %arg2[%c24, %c0_17] : memref<64x256xf32, #tpu.memory_space<vmem>>, vector<8x256xf32>
    %c24_18 = arith.constant 24 : index
    %c0_19 = arith.constant 0 : index
    %39 = vector.load %arg3[%c24_18, %c0_19] : memref<64x1xf32, #tpu.memory_space<vmem>>, vector<8x1xf32>
    %40 = vector.broadcast %39 : vector<8x1xf32> to vector<8x256xf32>
    %41 = arith.addf %40, %38 : vector<8x256xf32>
    %cst_20 = arith.constant 0.000000e+00 : f32
    %42 = vector.broadcast %cst_20 : f32 to vector<8x256xf32>
    %43 = arith.maximumf %41, %42 : vector<8x256xf32>
    %44 = arith.addf %5, %38 : vector<8x256xf32>
    %cst_21 = arith.constant 0.000000e+00 : f32
    %45 = vector.broadcast %cst_21 : f32 to vector<8x256xf32>
    %46 = arith.maximumf %44, %45 : vector<8x256xf32>
    %47 = arith.addf %43, %46 : vector<8x256xf32>
    %48 = arith.addf %37, %47 : vector<8x256xf32>
    %c32 = arith.constant 32 : index
    %c0_22 = arith.constant 0 : index
    %49 = vector.load %arg2[%c32, %c0_22] : memref<64x256xf32, #tpu.memory_space<vmem>>, vector<8x256xf32>
    %c32_23 = arith.constant 32 : index
    %c0_24 = arith.constant 0 : index
    %50 = vector.load %arg3[%c32_23, %c0_24] : memref<64x1xf32, #tpu.memory_space<vmem>>, vector<8x1xf32>
    %51 = vector.broadcast %50 : vector<8x1xf32> to vector<8x256xf32>
    %52 = arith.addf %51, %49 : vector<8x256xf32>
    %cst_25 = arith.constant 0.000000e+00 : f32
    %53 = vector.broadcast %cst_25 : f32 to vector<8x256xf32>
    %54 = arith.maximumf %52, %53 : vector<8x256xf32>
    %55 = arith.addf %5, %49 : vector<8x256xf32>
    %cst_26 = arith.constant 0.000000e+00 : f32
    %56 = vector.broadcast %cst_26 : f32 to vector<8x256xf32>
    %57 = arith.maximumf %55, %56 : vector<8x256xf32>
    %58 = arith.addf %54, %57 : vector<8x256xf32>
    %59 = arith.addf %48, %58 : vector<8x256xf32>
    %c40 = arith.constant 40 : index
    %c0_27 = arith.constant 0 : index
    %60 = vector.load %arg2[%c40, %c0_27] : memref<64x256xf32, #tpu.memory_space<vmem>>, vector<8x256xf32>
    %c40_28 = arith.constant 40 : index
    %c0_29 = arith.constant 0 : index
    %61 = vector.load %arg3[%c40_28, %c0_29] : memref<64x1xf32, #tpu.memory_space<vmem>>, vector<8x1xf32>
    %62 = vector.broadcast %61 : vector<8x1xf32> to vector<8x256xf32>
    %63 = arith.addf %62, %60 : vector<8x256xf32>
    %cst_30 = arith.constant 0.000000e+00 : f32
    %64 = vector.broadcast %cst_30 : f32 to vector<8x256xf32>
    %65 = arith.maximumf %63, %64 : vector<8x256xf32>
    %66 = arith.addf %5, %60 : vector<8x256xf32>
    %cst_31 = arith.constant 0.000000e+00 : f32
    %67 = vector.broadcast %cst_31 : f32 to vector<8x256xf32>
    %68 = arith.maximumf %66, %67 : vector<8x256xf32>
    %69 = arith.addf %65, %68 : vector<8x256xf32>
    %70 = arith.addf %59, %69 : vector<8x256xf32>
    %c48 = arith.constant 48 : index
    %c0_32 = arith.constant 0 : index
    %71 = vector.load %arg2[%c48, %c0_32] : memref<64x256xf32, #tpu.memory_space<vmem>>, vector<8x256xf32>
    %c48_33 = arith.constant 48 : index
    %c0_34 = arith.constant 0 : index
    %72 = vector.load %arg3[%c48_33, %c0_34] : memref<64x1xf32, #tpu.memory_space<vmem>>, vector<8x1xf32>
    %73 = vector.broadcast %72 : vector<8x1xf32> to vector<8x256xf32>
    %74 = arith.addf %73, %71 : vector<8x256xf32>
    %cst_35 = arith.constant 0.000000e+00 : f32
    %75 = vector.broadcast %cst_35 : f32 to vector<8x256xf32>
    %76 = arith.maximumf %74, %75 : vector<8x256xf32>
    %77 = arith.addf %5, %71 : vector<8x256xf32>
    %cst_36 = arith.constant 0.000000e+00 : f32
    %78 = vector.broadcast %cst_36 : f32 to vector<8x256xf32>
    %79 = arith.maximumf %77, %78 : vector<8x256xf32>
    %80 = arith.addf %76, %79 : vector<8x256xf32>
    %81 = arith.addf %70, %80 : vector<8x256xf32>
    %c56 = arith.constant 56 : index
    %c0_37 = arith.constant 0 : index
    %82 = vector.load %arg2[%c56, %c0_37] : memref<64x256xf32, #tpu.memory_space<vmem>>, vector<8x256xf32>
    %c56_38 = arith.constant 56 : index
    %c0_39 = arith.constant 0 : index
    %83 = vector.load %arg3[%c56_38, %c0_39] : memref<64x1xf32, #tpu.memory_space<vmem>>, vector<8x1xf32>
    %84 = vector.broadcast %83 : vector<8x1xf32> to vector<8x256xf32>
    %85 = arith.addf %84, %82 : vector<8x256xf32>
    %cst_40 = arith.constant 0.000000e+00 : f32
    %86 = vector.broadcast %cst_40 : f32 to vector<8x256xf32>
    %87 = arith.maximumf %85, %86 : vector<8x256xf32>
    %88 = arith.addf %5, %82 : vector<8x256xf32>
    %cst_41 = arith.constant 0.000000e+00 : f32
    %89 = vector.broadcast %cst_41 : f32 to vector<8x256xf32>
    %90 = arith.maximumf %88, %89 : vector<8x256xf32>
    %91 = arith.addf %87, %90 : vector<8x256xf32>
    %92 = arith.addf %81, %91 : vector<8x256xf32>
    %93 = vector.extract_strided_slice %92 {offsets = [0, 0], sizes = [8, 128], strides = [1, 1]} : vector<8x256xf32> to vector<8x128xf32>
    %94 = vector.extract_strided_slice %92 {offsets = [0, 128], sizes = [8, 128], strides = [1, 1]} : vector<8x256xf32> to vector<8x128xf32>
    %95 = arith.addf %93, %94 : vector<8x128xf32>
    %c0_42 = arith.constant 0 : index
    %c0_43 = arith.constant 0 : index
    %96 = vector.load %arg5[%c0_42, %c0_43] : memref<8x128xf32, #tpu.memory_space<vmem>>, vector<8x128xf32>
    %97 = arith.addf %96, %95 : vector<8x128xf32>
    %c0_44 = arith.constant 0 : index
    %c0_45 = arith.constant 0 : index
    %98 = vector.load %arg5[%c0_44, %c0_45] : memref<8x128xf32, #tpu.memory_space<vmem>>, vector<8x128xf32>
    tpu.vector_store %arg5[%c0_44, %c0_45], %97 {strides = array<i32>} : memref<8x128xf32, #tpu.memory_space<vmem>>, vector<8x128xf32>,
    return
  }
  func.func @transform_0(%arg0: i32, %arg1: i32) -> (i32, i32) {
    %c2_i32 = arith.constant 2 : i32
    %0 = arith.muli %arg0, %c2_i32 : i32
    %1 = arith.addi %0, %arg1 : i32
    %c0_i32 = arith.constant 0 : i32
    %c0_i32_0 = arith.constant 0 : i32
    return %1, %c0_i32 : i32, i32
  }
  func.func @transform_1(%arg0: i32, %arg1: i32) -> (i32, i32) {
    %c2_i32 = arith.constant 2 : i32
    %0 = arith.muli %arg0, %c2_i32 : i32
    %1 = arith.addi %0, %arg1 : i32
    %c0_i32 = arith.constant 0 : i32
    %c0_i32_0 = arith.constant 0 : i32
    return %1, %c0_i32 : i32, i32
  }
  func.func @transform_2(%arg0: i32, %arg1: i32) -> (i32, i32) {
    %c0_i32 = arith.constant 0 : i32
    %c0_i32_0 = arith.constant 0 : i32
    %c0_i32_1 = arith.constant 0 : i32
    return %c0_i32, %c0_i32_0 : i32, i32
  }
  func.func @transform_3(%arg0: i32, %arg1: i32) -> (i32, i32) {
    %c0_i32 = arith.constant 0 : i32
    %c0_i32_0 = arith.constant 0 : i32
    return %arg0, %c0_i32 : i32, i32
  }
}

</mosaic_0001>

<bundles_post_ra>
// kernel: tpu_custom_call.1
= control target key start
LH: loop header
LB: loop body
LE: loop exit
PB: predicated region body
PF: predicated region fallthrough
CT: control target
= control target key end

     0   :  { %8 = vsyncpa [#allocation3], 0  ;;  %s1098_s0 = inlined_call_operand.hbm [shape: f32[256,256], index: 0, kind: input, shape index: {}]   ;;  %s1099_s1 = inlined_call_operand.vmem [shape: f32[256,1], index: 1, kind: input, shape index: {}]   ;;  %s1100_s2 = inlined_call_operand.vmem [shape: f32[1,256], index: 2, kind: input, shape index: {}]   ;;  %s1101_s3 = inlined_call_operand.hbm [shape: f32[16,128], index: 3, kind: output, shape index: {}]  }
   0x1   :  { %10 = vsyncpa [#allocation3 + $0x1], 0 }
   0x2   :  { %11 = vsyncpa [#allocation4], 0 }
   0x3   :  { %13 = vsyncpa [#allocation4 + $0x1], 0  ;;  %s845_s12 = smov 0   ;;  %s847_s13 = smov 0  }
   0x4   :  { %s849_s14 = smov 0   ;;  %s851_s15 = smov 0  }
   0x5   :  { %s853_s16 = smov 0   ;;  %s855_s17 = smov 0  }
   0x6   :  { %s857_s18 = smov 0   ;;  %s859_s19 = smov 0  }
   0x7   :  { %s861_s20 = smov 0   ;;  %s863_s21 = smov 0  }
   0x8   :  { %s865_s22 = smov 0  }
   0x9 LB: > { %1106 = sst [smem:[#allocation8_spill]] %s809_s20  ;;  %s535_s23 = sadd.s32 4294967295, %s817_s22   ;;  %s817_s22 = sphi %s865_s22, %s19_s22   ;;  %s813_s21 = sphi %s863_s21, %s1118_s21   ;;  %s809_s20 = sphi %s861_s20, %s1117_s20   ;;  %s805_s19 = sphi %s859_s19, %s1116_s19   ;;  %s801_s18 = sphi %s857_s18, %s1115_s18   ;;  %s797_s17 = sphi %s855_s17, %s1124_s17   ;;  %s793_s16 = sphi %s853_s16, %s1123_s16   ;;  %s789_s15 = sphi %s851_s15, %s1122_s15   ;;  %s785_s14 = sphi %s849_s14, %s1121_s14   ;;  %s781_s13 = sphi %s847_s13, %s1120_s13   ;;  %s777_s12 = sphi %s845_s12, %s1119_s12  }
   0xa   : > { %1107 = sst [smem:[#allocation9_spill]] %s813_s21  ;;  %s536_s24 = sadd.s32 4294967294, %s817_s22  }
   0xb   : > { %s28_s25 = sadd.s32 1, %s809_s20  ;;  %s31_s26 = sadd.s32 1, %s813_s21 }
   0xc   : > { %p29_p0 = scmp.ge.s32.totalorder %s28_s25, 2  ;;  %s537_s27 = sshll.u32 %s813_s21, 1 }
   0xd   : > { %s904_s28 = sadd.s32 %s809_s20, %s537_s27  ;;  %s42_s29 = sadd.s32 1, %s797_s17 }
   0xe   : > { %s1126_s25 = smov (%p29_p0, %s28_s25), 0  ;;  %s1128_s26 = smov (!%p29_p0, %s31_s26), %s813_s21 }
   0xf   : > { %1108 = sst [smem:[#allocation10_spill]] %s1126_s25  ;;  %p49_p1 = scmp.ne.s32.totalorder %s797_s17, %s793_s16 }
  0x10   : > { %p50_p2 = scmp.eq.s32.totalorder %s817_s22, 0  ;;  %p33_p3 = scmp.ge.s32.totalorder %s1128_s26, 2 }
  0x11   : > { %p55_p4 = scmp.ne.s32.totalorder %s793_s16, %s789_s15  ;;  %p56_p6 = scmp.eq.s32.totalorder %s535_s23, 0 }
  0x12   : > { %p914_p5 = por %p50_p2, %p49_p1  ;;  %s1130_s26 = smov (%p33_p3, %s1128_s26), 0 }
  0x13   : > { %1110 = sst [smem:[#allocation11_spill]] %s1130_s26  ;;  %p920_p7 = por %p56_p6, %p55_p4 }
  0x14   : > { %s119_s5 = sadd.s32 1, %s785_s14  ;;  %s538_s6 = sshll.u32 %s1130_s26, 1 }
  0x15   : > { %s116_s7 = ssub.s32 %s813_s21, %s1130_s26  ;;  %s38_s8 = sadd.s32 %s538_s6, %s1126_s25 }
  0x16   : > { %p117_p8 = scmp.eq.s32.totalorder %s116_s7, 0  ;;  %s39_s9 = ssub.s32 %s904_s28, %s38_s8 }
  0x17   : > { %p129_p9 = scmp.ne.s32.totalorder %s785_s14, %s781_s13  ;;  %p40_p10 = scmp.eq.s32.totalorder %s39_s9, 0 }
  0x18   : > { %p130_p11 = scmp.eq.s32.totalorder %s535_s23, 3  ;;  %p135_p13 = scmp.ne.s32.totalorder %s781_s13, %s777_s12 }
  0x19   : > { %s933_s10 = scalar_select %p117_p8, %s785_s14, %s119_s5  }
  0x1a   : > { %s936_s11 = scalar_select %p40_p10, %s797_s17, %s42_s29  }
  0x1b   : > { %p938_p12 = por %p130_p11, %p129_p9  ;;  %p136_p0 = scmp.eq.s32.totalorder %s536_s24, 3 }
  0x1c   : > { %p573_p1 = scmp.lt.s32.totalorder %s817_s22, 4  ;;  %s159_s27 = sand.u32 1, %s797_s17  }
  0x1d   : > { %p948_p2 = por %p136_p0, %p135_p13  ;;  %s543_s7 = sshll.u32 %s159_s27, 7 }
  0x1e   : > { %s560_s8 = sshll.u32 %s904_s28, 11  ;;  %s163_s9 = scalar_lea.vmem [#allocation2], %s543_s7 }
  0x1f   : > { %s172_s29 = scalar_lea.hbm %s1098_s0, %s560_s8  ;;  %s173_s26 = sshll.u32 %s163_s9, 4  ;;  %s174_s26 = int_to_ptr.vmem [resolvable:$true] %s173_s26 }
  0x20   : > { %p958_p3 = pnand %p573_p1, %p914_p5  ;;  %s160_s24 = scalar_lea.sflag [#allocation3], %s159_s27 }
  0x21   : > { %s682_s21 = scalar_lea.vmem %s174_s26, 2048  ;;  %s819_s28 = smov [#allocation2]  }
  0x22   : > { %p671_p4 = pneg %p958_p3  ;;  %p683_p6 = scmp.ne.s32.totalorder %s174_s26, %s682_s21 }
  0x23   : > { %s687_s20 = sshll.u32 %s819_s28, 4  ;;  %s688_s20 = int_to_ptr.vmem [resolvable:$false] %s687_s20 }
  0x24   : > { %p685_p8 = pnand %p683_p6, %p671_p4  ;;  %s689_s8 = scalar_lea.vmem %s688_s20, 4096 }
  0x25   : > { %p690_p10 = scmp.lt.s32.totalorder %s174_s26, %s688_s20  ;;  %p691_p11 = scmp.lt.s32.totalorder %s689_s8, %s682_s21 }
  0x26   : > { %p686_p9 = pneg %p685_p8 }
  0x27   : > { %p692_p13 = por %p691_p11, %p690_p10 }
  0x29   : > { %p693_p5 = pnand %p692_p13, %p686_p9 }
  0x2b   : > { %696 = shalt.err (!%p693_p5)
}
  0x2c   : > { %s820_s30 = smov 256   ;;  %s821_s27 = smov 16  }
  0x2d   : > { %568 = dma.hbm_to_vmem [thread:$0]  (!%p958_p3), %s172_s29, 2048, %s174_s26, %s160_s24, %s820_s30, %s820_s30, %s821_s27  }
  0x2e   : > { %p548_p0 = scmp.ge.s32.totalorder %s817_s22, 1  ;;  %p194_p1 = scmp.lt.s32.totalorder %s817_s22, 5 }
  0x30   : > { %p195_p4 = pnand %p548_p0, %p194_p1 }
  0x31   : > { %s200_s7 = sand.u32 (!%p195_p4), 1, %s793_s16  }
  0x32   : > { %198 = sbr.rel (%p195_p4) target bundleno = 236 (0xec), region = 32  ;;  %s549_s23 = sshll.u32 (!%p195_p4), %s200_s7, 7 }
  0x33   : > { %s201_s20 = scalar_lea.sflag (!%p195_p4), [#allocation3], %s200_s7  ;;  %s969_s21 = scalar_lea.vmem (!%p195_p4), [#allocation2], %s549_s23 }
  0x37   : > { %768 = dma.done.wait (%p920_p7), %s201_s20, 2048  }
  0x38   : > { %770 = vsyncadd (%p920_p7), %s201_s20, 4294965248  ;;  %s231_s25 = sand.u32 1, %s781_s13   ;;  %s551_s26 = sshll.u32 %s805_s19, 1 }
  0x39   : > { %s550_s5 = sshll.u32 %s231_s25, 3  ;;  %s238_s29 = sadd.s32 %s801_s18, %s551_s26 }
  0x3a   : > { %s552_s9 = sshll.u32 %s238_s29, 3  ;;  %s983_s27 = scalar_lea.vmem [#allocation5], %s550_s5 }
  0x3b   : > { %p240_p3 = scmp.lt.s32.totalorder %s552_s9, 31  ;;  %p554_p7 = scmp.ne.s32.totalorder %s801_s18, 0 }
  0x3d   : > { %s1132_s9 = smov (!%p240_p3, %s552_s9), 31  ;;  %250 = sbr.rel (%p554_p7) target bundleno = 68 (0x44), region = 40 }
  0x3e   : > { %s553_s24 = sshll.u32 %s1132_s9, 3 }
  0x3f   : > { %s243_s30 = scalar_lea.vmem %s1099_s1, %s553_s24 }
  0x42   : > { %v822_v0 = vmov 0.0  }
  0x43   : > { %251 = vst [vmem:[%s983_s27] sm:$0xff] %v822_v0 }
  0x44 PF: > { %v304_v1 = vld [vmem:[%s243_s30 + $0x10] sm:$0xff]  ;;  %v266_v2 = vld [vmem:[%s243_s30] sm:$0xff]  ;;  %v823_v3 = vmov 0   ;;  %v324_v4 = vld [vmem:[%s243_s30 + $0x18] sm:$0xff]  ;;  %v254_v10 = vlaneseq  ;;  %s556_s7 = sshll.u32 %s805_s19, 7  ;;  %s440_s23 = sshll.u32 %s983_s27, 4  ;;  %s441_s23 = int_to_ptr.vmem [resolvable:$true] %s440_s23 }
  0x45   : > { %668 = vset.pattern.permute.xlu1 %v823_v3  ;;  %667 = vset.pattern.permute.xlu0 %v823_v3  ;;  %v284_v5 = vld [vmem:[%s243_s30 + $0x8] sm:$0xff]  ;;  %v344_v7 = vld [vmem:[%s243_s30 + $0x20] sm:$0xff]  ;;  %v404_v8 = vld [vmem:[%s243_s30 + $0x38] sm:$0xff]  ;;  %s438_s26 = scalar_lea.hbm %s1101_s3, %s556_s7  ;;  %s427_s5 = scalar_lea.sflag [#allocation4], %s231_s25 }
  0x46   : > { %307 = vperm.xlu1 %668, %v304_v1   ;;  %269 = vperm.xlu0 %667, %v266_v2   ;;  %v364_v6 = vld [vmem:[%s243_s30 + $0x28] sm:$0xff]  ;;  %v384_v9 = vld [vmem:[%s243_s30 + $0x30] sm:$0xff]  ;;  %v255_v11 = vshrl.u32 %v254_v10, 7  ;;  %v252_v14 = vld [vmem:[%s1100_s2] sm:$0x3]  ;;  %s697_s29 = scalar_lea.vmem %s441_s23, 128 }
  0x47   : > { %v302_v15 = vld [vmem:[%s969_s21 + $0x20] sm:$0xff]  ;;  %v303_v18 = vld [vmem:[%s969_s21 + $0x28] sm:$0xff]  ;;  %v322_v21 = vld [vmem:[%s969_s21 + $0x30] sm:$0xff]  ;;  %p698_p6 = scmp.ne.s32.totalorder %s441_s23, %s697_s29  ;;  %s824_s9 = smov [#allocation5]  }
  0x48   : > { %v256_v12 = vsub.s32 0, %v255_v11  ;;  %v260_v13 = vsub.s32 1, %v255_v11  ;;  %v264_v19 = vld [vmem:[%s969_s21] sm:$0xff]  ;;  %v265_v20 = vld [vmem:[%s969_s21 + $0x8] sm:$0xff]  ;;  %v323_v22 = vld [vmem:[%s969_s21 + $0x38] sm:$0xff]  ;;  %s701_s24 = sshll.u32 %s824_s9, 4  ;;  %s702_s24 = int_to_ptr.vmem [resolvable:$false] %s701_s24 }
  0x49   : > { %v282_v23 = vld [vmem:[%s969_s21 + $0x10] sm:$0xff]  ;;  %v283_v24 = vld [vmem:[%s969_s21 + $0x18] sm:$0xff]  ;;  %v342_v35 = vld [vmem:[%s969_s21 + $0x40] sm:$0xff]  ;;  %p699_p8 = pnand %p698_p6, %p938_p12  ;;  %s703_s19 = scalar_lea.vmem %s702_s24, 256 }
  0x4a   : > { %327 = vperm.xlu1 %668, %v324_v4   ;;  %287 = vperm.xlu0 %667, %v284_v5   ;;  %v257_v16 = vrot.slane %v252_v14, %v256_v12  ;;  %v261_v17 = vrot.slane %v252_v14, %v260_v13  ;;  %v362_v33 = vld [vmem:[%s969_s21 + $0x50] sm:$0xff]  ;;  %v363_v34 = vld [vmem:[%s969_s21 + $0x58] sm:$0xff]  ;;  %v343_v42 = vld [vmem:[%s969_s21 + $0x48] sm:$0xff]  ;;  %p704_p10 = scmp.lt.s32.totalorder %s441_s23, %s702_s24  ;;  %p705_p11 = scmp.lt.s32.totalorder %s703_s19, %s697_s29 }
  0x4b   : > { %v1013_v43 = vld [vmem:[%s969_s21 + $0x70] sm:$0xff]  ;;  %v403_v48 = vld [vmem:[%s969_s21 + $0x78] sm:$0xff]  ;;  %v382_v49 = vld [vmem:[%s969_s21 + $0x60] sm:$0xff]  ;;  %p700_p9 = pneg %p699_p8 }
  0x4c   : > { %v998_v25 = vadd.f32 %v302_v15, %v257_v16  ;;  %v1000_v26 = vadd.f32 %v303_v18, %v261_v17  ;;  %v276_v27 = vadd.f32 %v264_v19, %v257_v16  ;;  %v277_v28 = vadd.f32 %v265_v20, %v261_v17  ;;  %v383_v50 = vld [vmem:[%s969_s21 + $0x68] sm:$0xff]  ;;  %p706_p13 = por %p705_p11, %p704_p10 }
  0x4d   : > { %v1002_v29 = vadd.f32 %v322_v21, %v257_v16  ;;  %v1004_v30 = vadd.f32 %v323_v22, %v261_v17  ;;  %v294_v31 = vadd.f32 %v282_v23, %v257_v16  ;;  %v295_v32 = vadd.f32 %v283_v24, %v261_v17 }
  0x4e   : > { %367 = vperm.xlu1 %668, %v364_v6   ;;  %347 = vperm.xlu0 %667, %v344_v7   ;;  %v316_v37 = vmax.f32 %v998_v25, 0.0  ;;  %v317_v38 = vmax.f32 %v1000_v26, 0.0  ;;  %v278_v40 = vmax.f32 %v276_v27, 0.0  ;;  %v279_v41 = vmax.f32 %v277_v28, 0.0  ;;  %p707_p5 = pnand %p706_p13, %p700_p9 }
  0x4f   : > { %v1015_v46 = vadd.f32 %v362_v33, %v257_v16  ;;  %v1017_v47 = vadd.f32 %v363_v34, %v261_v17  ;;  %v336_v51 = vmax.f32 %v1002_v29, 0.0  ;;  %v337_v52 = vmax.f32 %v1004_v30, 0.0 }
  0x50   : > { %v296_v53 = vmax.f32 %v294_v31, 0.0  ;;  %v297_v54 = vmax.f32 %v295_v32, 0.0  ;;  %v354_v57 = vadd.f32 %v342_v35, %v257_v16  ;;  %v355_v58 = vadd.f32 %v343_v42, %v261_v17 }
  0x51   : > { %v1025_v61 = vadd.f32 %v1013_v43, %v257_v16  ;;  %v1027_v62 = vadd.f32 %v403_v48, %v261_v17  ;;  %v1029_v63 = vadd.f32 %v382_v49, %v257_v16  ;;  %v1031_v0 = vadd.f32 %v383_v50, %v261_v17 }
  0x52   : > { %407 = vperm.xlu1 %668, %v404_v8   ;;  %387 = vperm.xlu0 %667, %v384_v9   ;;  %v376_v3 = vmax.f32 %v1015_v46, 0.0  ;;  %v377_v4 = vmax.f32 %v1017_v47, 0.0  ;;  %v356_v11 = vmax.f32 %v354_v57, 0.0  ;;  %v357_v12 = vmax.f32 %v355_v58, 0.0 }
  0x53   : > { %v416_v29 = vmax.f32 %v1025_v61, 0.0  ;;  %v417_v30 = vmax.f32 %v1027_v62, 0.0 }
  0xc1   : > { %v308_v36 = vpop.permute.xlu1 %307  ;;  %v270_v39 = vpop.permute.xlu0 %269 }
  0xc2   : > { %v272_v44 = vadd.f32 %v270_v39, %v264_v19  ;;  %v273_v45 = vadd.f32 %v270_v39, %v265_v20  ;;  %v310_v55 = vadd.f32 %v308_v36, %v302_v15  ;;  %v311_v56 = vadd.f32 %v308_v36, %v303_v18 }
  0xc4   : > { %v274_v1 = vmax.f32 %v272_v44, 0.0  ;;  %v275_v2 = vmax.f32 %v273_v45, 0.0  ;;  %v312_v9 = vmax.f32 %v310_v55, 0.0  ;;  %v313_v10 = vmax.f32 %v311_v56, 0.0 }
  0xc5   : > { %v328_v59 = vpop.permute.xlu1 %327  ;;  %v288_v60 = vpop.permute.xlu0 %287 }
  0xc6   : > { %v330_v5 = vadd.f32 %v328_v59, %v322_v21  ;;  %v331_v6 = vadd.f32 %v328_v59, %v323_v22  ;;  %v290_v7 = vadd.f32 %v288_v60, %v282_v23  ;;  %v291_v8 = vadd.f32 %v288_v60, %v283_v24 }
  0xc7   : > { %v280_v27 = vadd.f32 %v278_v40, %v274_v1  ;;  %v281_v28 = vadd.f32 %v279_v41, %v275_v2  ;;  %v318_v23 = vadd.f32 %v316_v37, %v312_v9  ;;  %v319_v24 = vadd.f32 %v317_v38, %v313_v10 }
  0xc8   : > { %v332_v13 = vmax.f32 %v330_v5, 0.0  ;;  %v333_v14 = vmax.f32 %v331_v6, 0.0  ;;  %v292_v15 = vmax.f32 %v290_v7, 0.0  ;;  %v293_v16 = vmax.f32 %v291_v8, 0.0  ;;  %v423_v7 = vld [vmem:[%s983_s27] sm:$0xff] }
  0xc9   : > { %v368_v17 = vpop.permute.xlu1 %367  ;;  %v348_v18 = vpop.permute.xlu0 %347 }
  0xca   : > { %v370_v19 = vadd.f32 %v368_v17, %v362_v33  ;;  %v371_v20 = vadd.f32 %v368_v17, %v363_v34  ;;  %v350_v25 = vadd.f32 %v348_v18, %v342_v35  ;;  %v351_v26 = vadd.f32 %v348_v18, %v343_v42 }
  0xcb   : > { %v298_v21 = vadd.f32 %v296_v53, %v292_v15  ;;  %v299_v22 = vadd.f32 %v297_v54, %v293_v16  ;;  %v338_v33 = vadd.f32 %v336_v51, %v332_v13  ;;  %v339_v34 = vadd.f32 %v337_v52, %v333_v14 }
  0xcc   : > { %v352_v36 = vmax.f32 %v350_v25, 0.0  ;;  %v353_v39 = vmax.f32 %v351_v26, 0.0  ;;  %v372_v35 = vmax.f32 %v370_v19, 0.0  ;;  %v373_v42 = vmax.f32 %v371_v20, 0.0 }
  0xcd   : > { %v300_v31 = vadd.f32 %v298_v21, %v280_v27  ;;  %v301_v32 = vadd.f32 %v299_v22, %v281_v28  ;;  %v408_v44 = vpop.permute.xlu1 %407  ;;  %v388_v45 = vpop.permute.xlu0 %387  ;;  %v396_v53 = vmax.f32 %v1029_v63, 0.0  ;;  %v397_v54 = vmax.f32 %v1031_v0, 0.0 }
  0xce   : > { %v410_v46 = vadd.f32 %v408_v44, %v1013_v43  ;;  %v411_v37 = vadd.f32 %v408_v44, %v403_v48  ;;  %v390_v38 = vadd.f32 %v388_v45, %v382_v49  ;;  %v391_v47 = vadd.f32 %v388_v45, %v383_v50 }
  0xcf   : > { %v320_v40 = vadd.f32 %v318_v23, %v300_v31  ;;  %v321_v41 = vadd.f32 %v319_v24, %v301_v32  ;;  %v358_v57 = vadd.f32 %v356_v11, %v352_v36  ;;  %v359_v58 = vadd.f32 %v357_v12, %v353_v39 }
  0xd0   : > { %v378_v59 = vadd.f32 %v376_v3, %v372_v35  ;;  %v379_v51 = vadd.f32 %v377_v4, %v373_v42  ;;  %v392_v52 = vmax.f32 %v390_v38, 0.0  ;;  %v393_v60 = vmax.f32 %v391_v47, 0.0 }
  0xd1   : > { %v340_v55 = vadd.f32 %v338_v33, %v320_v40  ;;  %v341_v56 = vadd.f32 %v339_v34, %v321_v41  ;;  %v412_v48 = vmax.f32 %v410_v46, 0.0  ;;  %v413_v49 = vmax.f32 %v411_v37, 0.0 }
  0xd2   : > { %v398_v63 = vadd.f32 %v396_v53, %v392_v52  ;;  %v399_v0 = vadd.f32 %v397_v54, %v393_v60 }
  0xd3   : > { %v360_v61 = vadd.f32 %v358_v57, %v340_v55  ;;  %v361_v43 = vadd.f32 %v359_v58, %v341_v56  ;;  %v418_v1 = vadd.f32 %v416_v29, %v412_v48  ;;  %v419_v2 = vadd.f32 %v417_v30, %v413_v49 }
  0xd5   : > { %v380_v50 = vadd.f32 %v378_v59, %v360_v61  ;;  %v381_v62 = vadd.f32 %v379_v51, %v361_v43 }
  0xd7   : > { %v400_v3 = vadd.f32 %v398_v63, %v380_v50  ;;  %v401_v4 = vadd.f32 %v399_v0, %v381_v62 }
  0xd9   : > { %v420_v5 = vadd.f32 %v418_v1, %v400_v3  ;;  %v421_v6 = vadd.f32 %v419_v2, %v401_v4 }
  0xdb   : > { %v422_v8 = vadd.f32 %v421_v6, %v420_v5 }
  0xdd   : > { %v424_v9 = vadd.f32 %v423_v7, %v422_v8 }
  0xdf   : > { %425 = vst [vmem:[%s983_s27] sm:$0xff] %v424_v9 }
  0xe0   : > { %710 = shalt.err (!%p707_p5)
}
  0xe1   : > { %s711_s28 = scalar_lea.hbm %s438_s26, 128  ;;  %s715_s30 = scalar_lea.hbm %s1101_s3, 256 }
  0xe2   : > { %p712_p0 = scmp.ne.s32.totalorder %s438_s26, %s711_s28  ;;  %p716_p3 = scmp.lt.s32.totalorder %s438_s26, %s1101_s3 }
  0xe3   : > { %p717_p7 = scmp.lt.s32.totalorder %s715_s30, %s711_s28 }
  0xe4   : > { %p713_p1 = pnand %p712_p0, %p938_p12 }
  0xe5   : > { %p718_p6 = por %p717_p7, %p716_p3 }
  0xe6   : > { %p714_p4 = pneg %p713_p1 }
  0xe8   : > { %p719_p8 = pnand %p718_p6, %p714_p4 }
  0xea   : > { %722 = shalt.err (!%p719_p8)
}
  0xeb   : > { %563 = dma.vmem_to_hbm [thread:$0]  (%p938_p12), %s441_s23, 128, %s438_s26, %s427_s5  }
  0xec PF: > { %p574_p9 = scmp.ge.s32.totalorder %s817_s22, 2  ;;  %s452_s4 = sand.u32 1, %s777_s12  }
  0xed   : > { %s453_s7 = scalar_lea.sflag [#allocation4], %s452_s4 }
  0xee   : > { %p570_p10 = pnand %p574_p9, %p948_p2 }
  0xf0   : > { %p571_p11 = pneg %p570_p10 }
  0xf2   : > { %772 = dma.done.wait (%p571_p11), %s453_s7, 128  }
  0xf3   : > { %774 = vsyncadd (%p571_p11), %s453_s7, 4294967168  ;;  %s19_s22 = sadd.s32 1, %s817_s22   ;;  %s1115_s18 = sld [smem:[#allocation8_spill]] }
  0xf4   : > { %p16_p13 = scmp.ge.s32.totalorder %s19_s22, 6   ;;  %s1116_s19 = sld [smem:[#allocation9_spill]] }
  0xf5   : > { %s1117_s20 = sld [smem:[#allocation10_spill]]  ;;  %s1119_s12 = smov %s781_s13 }
  0xf6   : > { %s1118_s21 = sld [smem:[#allocation11_spill]]  ;;  %s1120_s13 = smov %s785_s14 }
  0xf7   : > { %s1121_s14 = smov %s933_s10  ;;  %s1122_s15 = smov %s793_s16 }
  0xf8   : > { %s1123_s16 = smov %s797_s17  ;;  %s1124_s17 = smov %s936_s11 }
  0xf9   :  { %18 = sbr.rel (!%p16_p13) target bundleno = 9 (0x9), region = 84 }
  0xfe   :  { %458 = vsyncpa [#allocation3], 1 }
  0xff   :  { %460 = vsyncpa [#allocation3 + $0x1], 1 }
 0x100   :  { %461 = vsyncpa [#allocation4], 1 }
 0x101   :  { %463 = vsyncpa [#allocation4 + $0x1], 1 }

</bundles_post_ra>
